<compile_context>
chip_gen: v5e
topology: v5e:2x2
jax: 0.10.0
libtpu: 0.0.40
codegen_flags: <defaults>
</compile_context>

<pallas_src>
import jax
import jax.numpy as jnp
import numpy as np
from jax import lax
from jax.experimental import pallas as pl
from jax.experimental.pallas import tpu as pltpu


def _cdiv(a, b):
    return (a + b - 1) // b


def _round_up(a, b):
    return _cdiv(a, b) * b


def _tpu_cores_and_vmem():
    """(TensorCores per chip, VMEM bytes) with safe fallbacks (1 core, 64 MiB)."""
    cores, vmem = 1, 64 * 1024 * 1024
    try:
        info = pltpu.get_tpu_info()
        for name in ("num_cores", "core_count", "num_tensorcores",
                     "tensorcore_count", "tensor_cores_per_chip"):
            v = getattr(info, name, None)
            if isinstance(v, int) and v > 1:
                cores = int(v)
                break
        v = getattr(info, "vmem_capacity_bytes", None)
        if isinstance(v, int) and v > 0:
            vmem = int(v)
    except Exception:
        pass
    return cores, vmem


def _convpool_kernel(x_ref, a_ref, b_ref, o_ref):
    """Fused conv(k, s=1, zero-pad) + bias + ReLU + maxpool(2,2) for TB images.

    x_ref: (TB, 2, Hh, WpCp)   row-parity-split, (W,Cin)-fused, lane-padded
                               padded input (compute dtype).
    a_ref: (KH, WpCp, 2*PWCo)  banded weights; input lane = w*Cin + cin,
                               output lane = dx*(PW*Cout) + pw*Cout + cout.
    b_ref: (1, PWCo)           f32 bias tiled over pw  (PWCo = PW*Cout).
    o_ref: (TB, PH, PWCo)      pooled output tile, fully lane-packed.
    """
    tb = x_ref.shape[0]
    n_taps = a_ref.shape[0]                  # = KH
    ph = o_ref.shape[1]
    pwco = o_ref.shape[2]

    for b in range(tb):                      # static, small (<= 8)
        # Two f32 accumulators, one per pooling row-phase dy.  The row band for
        # t = dy + kh is loaded once and reused by both accumulators.
        q0 = jnp.zeros((ph, 2 * pwco), jnp.float32)
        q1 = jnp.zeros((ph, 2 * pwco), jnp.float32)
        for t in range(n_taps + 1):
            rows = x_ref[b, t % 2, t // 2:t // 2 + ph, :]        # (PH, WpCp)
            if t < n_taps:                   # contributes to dy = 0
                q0 = q0 + jnp.dot(rows, a_ref[t],
                                  preferred_element_type=jnp.float32)
            if t >= 1:                       # contributes to dy = 1
                q1 = q1 + jnp.dot(rows, a_ref[t - 1],
                                  preferred_element_type=jnp.float32)
        m = jnp.maximum(q0, q1)                                   # pool over dy
        r = jnp.maximum(m[:, :pwco], m[:, pwco:])                 # pool over dx
        # bias + ReLU once, after the window max; arithmetic in f32, cast only
        # at the store (review item 6a).
        o_ref[b] = jnp.maximum(r + b_ref[...], 0.0).astype(o_ref.dtype)


def conv_and_pool(x_nchw, w_oihw, bias, *, stride=1, padding=2, pool=2,
                  compute_dtype=jnp.bfloat16):
    """Forward pass of ConvandPool: conv(k, s=1, p) -> ReLU -> MaxPool2d(2, 2)."""
    assert stride == 1, "module is instantiated with stride=1"
    assert pool == 2, "module is instantiated with pool_size=pool_stride=2"
    N, Cin, H, W = x_nchw.shape
    Cout, Cin2, KH, KW = w_oihw.shape
    assert Cin == Cin2

    Ho = H + 2 * padding - KH + 1
    Wo = W + 2 * padding - KW + 1
    PH, PW = Ho // 2, Wo // 2                # floor mode == PyTorch default
    Hp, Wp = H + 2 * padding, W + 2 * padding
    WpC = Wp * Cin
    WpCp = _round_up(WpC, 128)               # lane-pad fused (W, Cin) dim
    PWCo = PW * Cout                         # packed output lane dim (no pad)
    out_dtype = x_nchw.dtype

    # ---- input: NHWC, cast EARLY (item 2), pad, fuse (W,Cin), parity-split ----
    xh = jnp.transpose(x_nchw, (0, 2, 3, 1)).astype(compute_dtype)   # (N,H,W,Cin)
    xp = jnp.pad(xh, ((0, 0), (padding, padding), (padding, padding), (0, 0)))
    xp = xp.reshape(N, Hp, WpC)
    xp = jnp.pad(xp, ((0, 0), (0, 0), (0, WpCp - WpC)))
    Hpe = _round_up(Hp, 2)
    xp = jnp.pad(xp, ((0, 0), (0, Hpe - Hp), (0, 0)))
    Hh = Hpe // 2
    assert PH + KH // 2 <= Hh
    # xq[n, parity, i, :] = xp[n, 2*i + parity, :]
    xq = xp.reshape(N, Hh, 2, WpCp).transpose(0, 2, 1, 3)             # (N,2,Hh,WpCp)

    # ---- weights: bake the (kw, cin) contraction and the pool column phase dx
    #      into banded matrices A[kh] (batch-independent, built once) ----------
    # A[kh, w*Cin + c, dx*PWCo + pw*Cout + co] = W[kh, kw, c, co]
    #   with w = 2*pw + dx + kw (the padded-input column feeding pooled col pw).
    wt = jnp.transpose(w_oihw, (2, 3, 1, 0)).astype(jnp.float32)      # (KH,KW,Cin,Cout)
    sel = np.zeros((2, KW, Wp, PW), np.float32)
    pw_idx = np.arange(PW)
    for dx in range(2):
        for kw in range(KW):
            sel[dx, kw, 2 * pw_idx + dx + kw, pw_idx] = 1.0
    a = jnp.einsum("xkwp,hkcd->xhwcpd", jnp.asarray(sel), wt)         # (2,KH,Wp,Cin,PW,Cout)
    a = a.reshape(2, KH, WpC, PWCo)
    a = jnp.pad(a, ((0, 0), (0, 0), (0, WpCp - WpC), (0, 0)))
    a = jnp.concatenate([a[0], a[1]], axis=-1).astype(compute_dtype)  # (KH,WpCp,2*PWCo)

    b2 = jnp.tile(bias.astype(jnp.float32), PW).reshape(1, PWCo)

    # ---- batch tiling: split into >= num_cores programs only when the chip
    #      actually has more than one TensorCore (v7x); otherwise pack as many
    #      images per step as VMEM / code size allow (items 4/5/6/10) ---------
    cores, vmem = _tpu_cores_and_vmem()
    itemsize = jnp.dtype(compute_dtype).itemsize
    out_isz = jnp.dtype(out_dtype).itemsize
    per_img = 2 * (2 * Hh * WpCp * itemsize) + 2 * (PH * PWCo * out_isz)  # dbl-buffered
    fixed = a.size * itemsize + b2.size * 4
    budget = max(vmem // 4, 4 * 1024 * 1024)       # generation-aware (item 9)
    tb_cap = int(max(1, min(8, (budget - fixed) // max(per_img, 1))))
    n_steps = max(cores if N >= cores else 1, _cdiv(N, tb_cap))
    TB = _cdiv(N, n_steps)
    Np = _round_up(N, TB)
    if Np > N:
        xq = jnp.pad(xq, ((0, Np - N), (0, 0), (0, 0), (0, 0)))
    grid = (Np // TB,)

    out = pl.pallas_call(
        _convpool_kernel,
        out_shape=jax.ShapeDtypeStruct((Np, PH, PWCo), out_dtype),
        grid_spec=pl.GridSpec(
            grid=grid,
            in_specs=[
                pl.BlockSpec((TB, 2, Hh, WpCp), lambda i: (i, 0, 0, 0)),
                pl.BlockSpec((KH, WpCp, 2 * PWCo), lambda i: (0, 0, 0)),
                pl.BlockSpec((1, PWCo), lambda i: (0, 0)),
            ],
            out_specs=pl.BlockSpec((TB, PH, PWCo), lambda i: (i, 0, 0)),
        ),
        compiler_params=pltpu.CompilerParams(
            dimension_semantics=("parallel",),
            # < 1 MiB actually needed per step; 32 MiB is within the scoped
            # VMEM limit on every generation, including v7x (64 MiB physical).
            vmem_limit_bytes=32 * 1024 * 1024,
        ),
    )(xq, a, b2)

    # Only the tiny real-sized output goes through the final NCHW permute
    # (required by the module's output layout).
    out = out[:N].reshape(N, PH, PW, Cout)
    return jnp.transpose(out, (0, 3, 1, 2)).astype(out_dtype)


if __name__ == "__main__":
    key = jax.random.PRNGKey(0)
    kx, kw, kb = jax.random.split(key, 3)

    # ConvandPool(in_channels=4, out_channels=8, kernel_size=5)
    N, Cin, H, W = 2, 4, 16, 16
    Cout, KS = 8, 5

    x = jax.random.normal(kx, (N, Cin, H, W), jnp.float32)
    fan_in = Cin * KS * KS
    bound = 1.0 / np.sqrt(fan_in)                 # PyTorch-style uniform init
    w = jax.random.uniform(kw, (Cout, Cin, KS, KS), jnp.float32, -bound, bound)
    b = jax.random.uniform(kb, (Cout,), jnp.float32, -bound, bound)

    # pure-JAX reference (conv -> relu -> maxpool), PyTorch semantics
    y_conv = lax.conv_general_dilated(
        x, w, window_strides=(1, 1), padding=((2, 2), (2, 2)),
        dimension_numbers=("NCHW", "OIHW", "NCHW")) + b.reshape(1, Cout, 1, 1)
    y_ref = lax.reduce_window(
        jnp.maximum(y_conv, 0.0), -jnp.inf, lax.max,
        window_dimensions=(1, 1, 2, 2), window_strides=(1, 1, 2, 2),
        padding="VALID")

    fwd_f32 = jax.jit(lambda xx, ww, bb: conv_and_pool(
        xx, ww, bb, compute_dtype=jnp.float32))
    fwd_bf16 = jax.jit(lambda xx, ww, bb: conv_and_pool(xx, ww, bb))

    # 1) exact-dtype path (f32 everywhere) -- tight numerical check
    y32 = jax.block_until_ready(fwd_f32(x, w, b))
    assert y32.shape == y_ref.shape == (N, Cout, H // 2, W // 2)
    np.testing.assert_allclose(np.asarray(y32), np.asarray(y_ref),
                               rtol=2e-4, atol=2e-4)

    # 2) default fast path (bf16 inputs/weights, f32 accumulation) -- loose check
    y = jax.block_until_ready(fwd_bf16(x, w, b))
    assert y.shape == y_ref.shape
    np.testing.assert_allclose(np.asarray(y), np.asarray(y_ref),
                               rtol=5e-2, atol=5e-2)

    print("KERNEL_OK")
</pallas_src>

<mosaic_0001>
module attributes {stable_mosaic.version = 11 : i64} {
  func.func @_convpool_kernel(%arg0: i32, %arg1: memref<2x2x10x128xf32, #tpu.memory_space<vmem>>, %arg2: memref<5x128x128xf32, #tpu.memory_space<vmem>>, %arg3: memref<1x64xf32, #tpu.memory_space<vmem>>, %arg4: memref<2x8x64xf32, #tpu.memory_space<vmem>>) attributes {dimension_semantics = [#tpu.dimension_semantics<parallel>], iteration_bounds = array<i64: 1>, scalar_prefetch = 0 : i64, scratch_operands = 0 : i64, tpu.core_type = #tpu.core_type<tc>, window_params = [{transform_indices = @transform_0, window_bounds = array<i64: 2, 2, 10, 128>}, {pipeline_mode = #tpu.pipeline_mode<synchronous>, transform_indices = @transform_1, window_bounds = array<i64: 5, 128, 128>}, {pipeline_mode = #tpu.pipeline_mode<synchronous>, transform_indices = @transform_2, window_bounds = array<i64: 1, 64>}, {transform_indices = @transform_3, window_bounds = array<i64: 2, 8, 64>}]} {
    %cst = arith.constant 0.000000e+00 : f32
    %0 = vector.broadcast %cst : f32 to vector<8x128xf32>
    %cst_0 = arith.constant 0.000000e+00 : f32
    %1 = vector.broadcast %cst_0 : f32 to vector<8x128xf32>
    %c0 = arith.constant 0 : index
    %c0_1 = arith.constant 0 : index
    %c0_2 = arith.constant 0 : index
    %c0_3 = arith.constant 0 : index
    %2 = vector.load %arg1[%c0, %c0_1, %c0_2, %c0_3] : memref<2x2x10x128xf32, #tpu.memory_space<vmem>>, vector<1x1x8x128xf32>
    %3 = vector.shape_cast %2 : vector<1x1x8x128xf32> to vector<8x128xf32>
    %c0_4 = arith.constant 0 : index
    %c0_5 = arith.constant 0 : index
    %c0_6 = arith.constant 0 : index
    %4 = vector.load %arg2[%c0_4, %c0_5, %c0_6] : memref<5x128x128xf32, #tpu.memory_space<vmem>>, vector<1x128x128xf32>
    %5 = vector.shape_cast %4 : vector<1x128x128xf32> to vector<128x128xf32>
    %cst_7 = arith.constant dense<0.000000e+00> : vector<8x128xf32>
    %6 = tpu.matmul %3, %5, %cst_7 {dimension_numbers = #tpu.dot_dimension_numbers<[1], [0], [0], [1], [0, 0, 1, 1], [], []>} : vector<8x128xf32>, vector<128x128xf32>, vector<8x128xf32> -> vector<8x128xf32>
    %7 = arith.addf %0, %6 : vector<8x128xf32>
    %c0_8 = arith.constant 0 : index
    %c1 = arith.constant 1 : index
    %c0_9 = arith.constant 0 : index
    %c0_10 = arith.constant 0 : index
    %8 = vector.load %arg1[%c0_8, %c1, %c0_9, %c0_10] : memref<2x2x10x128xf32, #tpu.memory_space<vmem>>, vector<1x1x8x128xf32>
    %9 = vector.shape_cast %8 : vector<1x1x8x128xf32> to vector<8x128xf32>
    %c1_11 = arith.constant 1 : index
    %c0_12 = arith.constant 0 : index
    %c0_13 = arith.constant 0 : index
    %10 = vector.load %arg2[%c1_11, %c0_12, %c0_13] : memref<5x128x128xf32, #tpu.memory_space<vmem>>, vector<1x128x128xf32>
    %11 = vector.shape_cast %10 : vector<1x128x128xf32> to vector<128x128xf32>
    %cst_14 = arith.constant dense<0.000000e+00> : vector<8x128xf32>
    %12 = tpu.matmul %9, %11, %cst_14 {dimension_numbers = #tpu.dot_dimension_numbers<[1], [0], [0], [1], [0, 0, 1, 1], [], []>} : vector<8x128xf32>, vector<128x128xf32>, vector<8x128xf32> -> vector<8x128xf32>
    %13 = arith.addf %7, %12 : vector<8x128xf32>
    %c0_15 = arith.constant 0 : index
    %c0_16 = arith.constant 0 : index
    %c0_17 = arith.constant 0 : index
    %14 = vector.load %arg2[%c0_15, %c0_16, %c0_17] : memref<5x128x128xf32, #tpu.memory_space<vmem>>, vector<1x128x128xf32>
    %15 = vector.shape_cast %14 : vector<1x128x128xf32> to vector<128x128xf32>
    %cst_18 = arith.constant dense<0.000000e+00> : vector<8x128xf32>
    %16 = tpu.matmul %9, %15, %cst_18 {dimension_numbers = #tpu.dot_dimension_numbers<[1], [0], [0], [1], [0, 0, 1, 1], [], []>} : vector<8x128xf32>, vector<128x128xf32>, vector<8x128xf32> -> vector<8x128xf32>
    %17 = arith.addf %1, %16 : vector<8x128xf32>
    %c0_19 = arith.constant 0 : index
    %c0_20 = arith.constant 0 : index
    %c1_21 = arith.constant 1 : index
    %c0_22 = arith.constant 0 : index
    %18 = vector.load %arg1[%c0_19, %c0_20, %c1_21, %c0_22] : memref<2x2x10x128xf32, #tpu.memory_space<vmem>>, vector<1x1x8x128xf32>
    %19 = vector.shape_cast %18 : vector<1x1x8x128xf32> to vector<8x128xf32>
    %c2 = arith.constant 2 : index
    %c0_23 = arith.constant 0 : index
    %c0_24 = arith.constant 0 : index
    %20 = vector.load %arg2[%c2, %c0_23, %c0_24] : memref<5x128x128xf32, #tpu.memory_space<vmem>>, vector<1x128x128xf32>
    %21 = vector.shape_cast %20 : vector<1x128x128xf32> to vector<128x128xf32>
    %cst_25 = arith.constant dense<0.000000e+00> : vector<8x128xf32>
    %22 = tpu.matmul %19, %21, %cst_25 {dimension_numbers = #tpu.dot_dimension_numbers<[1], [0], [0], [1], [0, 0, 1, 1], [], []>} : vector<8x128xf32>, vector<128x128xf32>, vector<8x128xf32> -> vector<8x128xf32>
    %23 = arith.addf %13, %22 : vector<8x128xf32>
    %c1_26 = arith.constant 1 : index
    %c0_27 = arith.constant 0 : index
    %c0_28 = arith.constant 0 : index
    %24 = vector.load %arg2[%c1_26, %c0_27, %c0_28] : memref<5x128x128xf32, #tpu.memory_space<vmem>>, vector<1x128x128xf32>
    %25 = vector.shape_cast %24 : vector<1x128x128xf32> to vector<128x128xf32>
    %cst_29 = arith.constant dense<0.000000e+00> : vector<8x128xf32>
    %26 = tpu.matmul %19, %25, %cst_29 {dimension_numbers = #tpu.dot_dimension_numbers<[1], [0], [0], [1], [0, 0, 1, 1], [], []>} : vector<8x128xf32>, vector<128x128xf32>, vector<8x128xf32> -> vector<8x128xf32>
    %27 = arith.addf %17, %26 : vector<8x128xf32>
    %c0_30 = arith.constant 0 : index
    %c1_31 = arith.constant 1 : index
    %c1_32 = arith.constant 1 : index
    %c0_33 = arith.constant 0 : index
    %28 = vector.load %arg1[%c0_30, %c1_31, %c1_32, %c0_33] : memref<2x2x10x128xf32, #tpu.memory_space<vmem>>, vector<1x1x8x128xf32>
    %29 = vector.shape_cast %28 : vector<1x1x8x128xf32> to vector<8x128xf32>
    %c3 = arith.constant 3 : index
    %c0_34 = arith.constant 0 : index
    %c0_35 = arith.constant 0 : index
    %30 = vector.load %arg2[%c3, %c0_34, %c0_35] : memref<5x128x128xf32, #tpu.memory_space<vmem>>, vector<1x128x128xf32>
    %31 = vector.shape_cast %30 : vector<1x128x128xf32> to vector<128x128xf32>
    %cst_36 = arith.constant dense<0.000000e+00> : vector<8x128xf32>
    %32 = tpu.matmul %29, %31, %cst_36 {dimension_numbers = #tpu.dot_dimension_numbers<[1], [0], [0], [1], [0, 0, 1, 1], [], []>} : vector<8x128xf32>, vector<128x128xf32>, vector<8x128xf32> -> vector<8x128xf32>
    %33 = arith.addf %23, %32 : vector<8x128xf32>
    %c2_37 = arith.constant 2 : index
    %c0_38 = arith.constant 0 : index
    %c0_39 = arith.constant 0 : index
    %34 = vector.load %arg2[%c2_37, %c0_38, %c0_39] : memref<5x128x128xf32, #tpu.memory_space<vmem>>, vector<1x128x128xf32>
    %35 = vector.shape_cast %34 : vector<1x128x128xf32> to vector<128x128xf32>
    %cst_40 = arith.constant dense<0.000000e+00> : vector<8x128xf32>
    %36 = tpu.matmul %29, %35, %cst_40 {dimension_numbers = #tpu.dot_dimension_numbers<[1], [0], [0], [1], [0, 0, 1, 1], [], []>} : vector<8x128xf32>, vector<128x128xf32>, vector<8x128xf32> -> vector<8x128xf32>
    %37 = arith.addf %27, %36 : vector<8x128xf32>
    %c0_41 = arith.constant 0 : index
    %c0_42 = arith.constant 0 : index
    %c2_43 = arith.constant 2 : index
    %c0_44 = arith.constant 0 : index
    %38 = vector.load %arg1[%c0_41, %c0_42, %c2_43, %c0_44] : memref<2x2x10x128xf32, #tpu.memory_space<vmem>>, vector<1x1x8x128xf32>
    %39 = vector.shape_cast %38 : vector<1x1x8x128xf32> to vector<8x128xf32>
    %c4 = arith.constant 4 : index
    %c0_45 = arith.constant 0 : index
    %c0_46 = arith.constant 0 : index
    %40 = vector.load %arg2[%c4, %c0_45, %c0_46] : memref<5x128x128xf32, #tpu.memory_space<vmem>>, vector<1x128x128xf32>
    %41 = vector.shape_cast %40 : vector<1x128x128xf32> to vector<128x128xf32>
    %cst_47 = arith.constant dense<0.000000e+00> : vector<8x128xf32>
    %42 = tpu.matmul %39, %41, %cst_47 {dimension_numbers = #tpu.dot_dimension_numbers<[1], [0], [0], [1], [0, 0, 1, 1], [], []>} : vector<8x128xf32>, vector<128x128xf32>, vector<8x128xf32> -> vector<8x128xf32>
    %43 = arith.addf %33, %42 : vector<8x128xf32>
    %c3_48 = arith.constant 3 : index
    %c0_49 = arith.constant 0 : index
    %c0_50 = arith.constant 0 : index
    %44 = vector.load %arg2[%c3_48, %c0_49, %c0_50] : memref<5x128x128xf32, #tpu.memory_space<vmem>>, vector<1x128x128xf32>
    %45 = vector.shape_cast %44 : vector<1x128x128xf32> to vector<128x128xf32>
    %cst_51 = arith.constant dense<0.000000e+00> : vector<8x128xf32>
    %46 = tpu.matmul %39, %45, %cst_51 {dimension_numbers = #tpu.dot_dimension_numbers<[1], [0], [0], [1], [0, 0, 1, 1], [], []>} : vector<8x128xf32>, vector<128x128xf32>, vector<8x128xf32> -> vector<8x128xf32>
    %47 = arith.addf %37, %46 : vector<8x128xf32>
    %c0_52 = arith.constant 0 : index
    %c1_53 = arith.constant 1 : index
    %c2_54 = arith.constant 2 : index
    %c0_55 = arith.constant 0 : index
    %48 = vector.load %arg1[%c0_52, %c1_53, %c2_54, %c0_55] : memref<2x2x10x128xf32, #tpu.memory_space<vmem>>, vector<1x1x8x128xf32>
    %49 = vector.shape_cast %48 : vector<1x1x8x128xf32> to vector<8x128xf32>
    %c4_56 = arith.constant 4 : index
    %c0_57 = arith.constant 0 : index
    %c0_58 = arith.constant 0 : index
    %50 = vector.load %arg2[%c4_56, %c0_57, %c0_58] : memref<5x128x128xf32, #tpu.memory_space<vmem>>, vector<1x128x128xf32>
    %51 = vector.shape_cast %50 : vector<1x128x128xf32> to vector<128x128xf32>
    %cst_59 = arith.constant dense<0.000000e+00> : vector<8x128xf32>
    %52 = tpu.matmul %49, %51, %cst_59 {dimension_numbers = #tpu.dot_dimension_numbers<[1], [0], [0], [1], [0, 0, 1, 1], [], []>} : vector<8x128xf32>, vector<128x128xf32>, vector<8x128xf32> -> vector<8x128xf32>
    %53 = arith.addf %47, %52 : vector<8x128xf32>
    %54 = arith.maximumf %43, %53 : vector<8x128xf32>
    %55 = vector.extract_strided_slice %54 {offsets = [0, 0], sizes = [8, 64], strides = [1, 1]} : vector<8x128xf32> to vector<8x64xf32>
    %56 = vector.extract_strided_slice %54 {offsets = [0, 64], sizes = [8, 64], strides = [1, 1]} : vector<8x128xf32> to vector<8x64xf32>
    %57 = arith.maximumf %55, %56 : vector<8x64xf32>
    %c0_60 = arith.constant 0 : index
    %c0_61 = arith.constant 0 : index
    %58 = vector.load %arg3[%c0_60, %c0_61] : memref<1x64xf32, #tpu.memory_space<vmem>>, vector<1x64xf32>
    %59 = vector.broadcast %58 : vector<1x64xf32> to vector<8x64xf32>
    %60 = arith.addf %57, %59 : vector<8x64xf32>
    %cst_62 = arith.constant 0.000000e+00 : f32
    %61 = vector.broadcast %cst_62 : f32 to vector<8x64xf32>
    %62 = arith.maximumf %60, %61 : vector<8x64xf32>
    %c0_63 = arith.constant 0 : index
    %c0_64 = arith.constant 0 : index
    %c0_65 = arith.constant 0 : index
    %63 = vector.load %arg4[%c0_63, %c0_64, %c0_65] : memref<2x8x64xf32, #tpu.memory_space<vmem>>, vector<1x8x64xf32>
    %64 = vector.shape_cast %63 : vector<1x8x64xf32> to vector<8x64xf32>
    %65 = vector.shape_cast %62 : vector<8x64xf32> to vector<1x8x64xf32>
    tpu.vector_store %arg4[%c0_63, %c0_64, %c0_65], %65 {strides = array<i32>} : memref<2x8x64xf32, #tpu.memory_space<vmem>>, vector<1x8x64xf32>,
    %cst_66 = arith.constant 0.000000e+00 : f32
    %66 = vector.broadcast %cst_66 : f32 to vector<8x128xf32>
    %cst_67 = arith.constant 0.000000e+00 : f32
    %67 = vector.broadcast %cst_67 : f32 to vector<8x128xf32>
    %c1_68 = arith.constant 1 : index
    %c0_69 = arith.constant 0 : index
    %c0_70 = arith.constant 0 : index
    %c0_71 = arith.constant 0 : index
    %68 = vector.load %arg1[%c1_68, %c0_69, %c0_70, %c0_71] : memref<2x2x10x128xf32, #tpu.memory_space<vmem>>, vector<1x1x8x128xf32>
    %69 = vector.shape_cast %68 : vector<1x1x8x128xf32> to vector<8x128xf32>
    %c0_72 = arith.constant 0 : index
    %c0_73 = arith.constant 0 : index
    %c0_74 = arith.constant 0 : index
    %70 = vector.load %arg2[%c0_72, %c0_73, %c0_74] : memref<5x128x128xf32, #tpu.memory_space<vmem>>, vector<1x128x128xf32>
    %71 = vector.shape_cast %70 : vector<1x128x128xf32> to vector<128x128xf32>
    %cst_75 = arith.constant dense<0.000000e+00> : vector<8x128xf32>
    %72 = tpu.matmul %69, %71, %cst_75 {dimension_numbers = #tpu.dot_dimension_numbers<[1], [0], [0], [1], [0, 0, 1, 1], [], []>} : vector<8x128xf32>, vector<128x128xf32>, vector<8x128xf32> -> vector<8x128xf32>
    %73 = arith.addf %66, %72 : vector<8x128xf32>
    %c1_76 = arith.constant 1 : index
    %c1_77 = arith.constant 1 : index
    %c0_78 = arith.constant 0 : index
    %c0_79 = arith.constant 0 : index
    %74 = vector.load %arg1[%c1_76, %c1_77, %c0_78, %c0_79] : memref<2x2x10x128xf32, #tpu.memory_space<vmem>>, vector<1x1x8x128xf32>
    %75 = vector.shape_cast %74 : vector<1x1x8x128xf32> to vector<8x128xf32>
    %c1_80 = arith.constant 1 : index
    %c0_81 = arith.constant 0 : index
    %c0_82 = arith.constant 0 : index
    %76 = vector.load %arg2[%c1_80, %c0_81, %c0_82] : memref<5x128x128xf32, #tpu.memory_space<vmem>>, vector<1x128x128xf32>
    %77 = vector.shape_cast %76 : vector<1x128x128xf32> to vector<128x128xf32>
    %cst_83 = arith.constant dense<0.000000e+00> : vector<8x128xf32>
    %78 = tpu.matmul %75, %77, %cst_83 {dimension_numbers = #tpu.dot_dimension_numbers<[1], [0], [0], [1], [0, 0, 1, 1], [], []>} : vector<8x128xf32>, vector<128x128xf32>, vector<8x128xf32> -> vector<8x128xf32>
    %79 = arith.addf %73, %78 : vector<8x128xf32>
    %c0_84 = arith.constant 0 : index
    %c0_85 = arith.constant 0 : index
    %c0_86 = arith.constant 0 : index
    %80 = vector.load %arg2[%c0_84, %c0_85, %c0_86] : memref<5x128x128xf32, #tpu.memory_space<vmem>>, vector<1x128x128xf32>
    %81 = vector.shape_cast %80 : vector<1x128x128xf32> to vector<128x128xf32>
    %cst_87 = arith.constant dense<0.000000e+00> : vector<8x128xf32>
    %82 = tpu.matmul %75, %81, %cst_87 {dimension_numbers = #tpu.dot_dimension_numbers<[1], [0], [0], [1], [0, 0, 1, 1], [], []>} : vector<8x128xf32>, vector<128x128xf32>, vector<8x128xf32> -> vector<8x128xf32>
    %83 = arith.addf %67, %82 : vector<8x128xf32>
    %c1_88 = arith.constant 1 : index
    %c0_89 = arith.constant 0 : index
    %c1_90 = arith.constant 1 : index
    %c0_91 = arith.constant 0 : index
    %84 = vector.load %arg1[%c1_88, %c0_89, %c1_90, %c0_91] : memref<2x2x10x128xf32, #tpu.memory_space<vmem>>, vector<1x1x8x128xf32>
    %85 = vector.shape_cast %84 : vector<1x1x8x128xf32> to vector<8x128xf32>
    %c2_92 = arith.constant 2 : index
    %c0_93 = arith.constant 0 : index
    %c0_94 = arith.constant 0 : index
    %86 = vector.load %arg2[%c2_92, %c0_93, %c0_94] : memref<5x128x128xf32, #tpu.memory_space<vmem>>, vector<1x128x128xf32>
    %87 = vector.shape_cast %86 : vector<1x128x128xf32> to vector<128x128xf32>
    %cst_95 = arith.constant dense<0.000000e+00> : vector<8x128xf32>
    %88 = tpu.matmul %85, %87, %cst_95 {dimension_numbers = #tpu.dot_dimension_numbers<[1], [0], [0], [1], [0, 0, 1, 1], [], []>} : vector<8x128xf32>, vector<128x128xf32>, vector<8x128xf32> -> vector<8x128xf32>
    %89 = arith.addf %79, %88 : vector<8x128xf32>
    %c1_96 = arith.constant 1 : index
    %c0_97 = arith.constant 0 : index
    %c0_98 = arith.constant 0 : index
    %90 = vector.load %arg2[%c1_96, %c0_97, %c0_98] : memref<5x128x128xf32, #tpu.memory_space<vmem>>, vector<1x128x128xf32>
    %91 = vector.shape_cast %90 : vector<1x128x128xf32> to vector<128x128xf32>
    %cst_99 = arith.constant dense<0.000000e+00> : vector<8x128xf32>
    %92 = tpu.matmul %85, %91, %cst_99 {dimension_numbers = #tpu.dot_dimension_numbers<[1], [0], [0], [1], [0, 0, 1, 1], [], []>} : vector<8x128xf32>, vector<128x128xf32>, vector<8x128xf32> -> vector<8x128xf32>
    %93 = arith.addf %83, %92 : vector<8x128xf32>
    %c1_100 = arith.constant 1 : index
    %c1_101 = arith.constant 1 : index
    %c1_102 = arith.constant 1 : index
    %c0_103 = arith.constant 0 : index
    %94 = vector.load %arg1[%c1_100, %c1_101, %c1_102, %c0_103] : memref<2x2x10x128xf32, #tpu.memory_space<vmem>>, vector<1x1x8x128xf32>
    %95 = vector.shape_cast %94 : vector<1x1x8x128xf32> to vector<8x128xf32>
    %c3_104 = arith.constant 3 : index
    %c0_105 = arith.constant 0 : index
    %c0_106 = arith.constant 0 : index
    %96 = vector.load %arg2[%c3_104, %c0_105, %c0_106] : memref<5x128x128xf32, #tpu.memory_space<vmem>>, vector<1x128x128xf32>
    %97 = vector.shape_cast %96 : vector<1x128x128xf32> to vector<128x128xf32>
    %cst_107 = arith.constant dense<0.000000e+00> : vector<8x128xf32>
    %98 = tpu.matmul %95, %97, %cst_107 {dimension_numbers = #tpu.dot_dimension_numbers<[1], [0], [0], [1], [0, 0, 1, 1], [], []>} : vector<8x128xf32>, vector<128x128xf32>, vector<8x128xf32> -> vector<8x128xf32>
    %99 = arith.addf %89, %98 : vector<8x128xf32>
    %c2_108 = arith.constant 2 : index
    %c0_109 = arith.constant 0 : index
    %c0_110 = arith.constant 0 : index
    %100 = vector.load %arg2[%c2_108, %c0_109, %c0_110] : memref<5x128x128xf32, #tpu.memory_space<vmem>>, vector<1x128x128xf32>
    %101 = vector.shape_cast %100 : vector<1x128x128xf32> to vector<128x128xf32>
    %cst_111 = arith.constant dense<0.000000e+00> : vector<8x128xf32>
    %102 = tpu.matmul %95, %101, %cst_111 {dimension_numbers = #tpu.dot_dimension_numbers<[1], [0], [0], [1], [0, 0, 1, 1], [], []>} : vector<8x128xf32>, vector<128x128xf32>, vector<8x128xf32> -> vector<8x128xf32>
    %103 = arith.addf %93, %102 : vector<8x128xf32>
    %c1_112 = arith.constant 1 : index
    %c0_113 = arith.constant 0 : index
    %c2_114 = arith.constant 2 : index
    %c0_115 = arith.constant 0 : index
    %104 = vector.load %arg1[%c1_112, %c0_113, %c2_114, %c0_115] : memref<2x2x10x128xf32, #tpu.memory_space<vmem>>, vector<1x1x8x128xf32>
    %105 = vector.shape_cast %104 : vector<1x1x8x128xf32> to vector<8x128xf32>
    %c4_116 = arith.constant 4 : index
    %c0_117 = arith.constant 0 : index
    %c0_118 = arith.constant 0 : index
    %106 = vector.load %arg2[%c4_116, %c0_117, %c0_118] : memref<5x128x128xf32, #tpu.memory_space<vmem>>, vector<1x128x128xf32>
    %107 = vector.shape_cast %106 : vector<1x128x128xf32> to vector<128x128xf32>
    %cst_119 = arith.constant dense<0.000000e+00> : vector<8x128xf32>
    %108 = tpu.matmul %105, %107, %cst_119 {dimension_numbers = #tpu.dot_dimension_numbers<[1], [0], [0], [1], [0, 0, 1, 1], [], []>} : vector<8x128xf32>, vector<128x128xf32>, vector<8x128xf32> -> vector<8x128xf32>
    %109 = arith.addf %99, %108 : vector<8x128xf32>
    %c3_120 = arith.constant 3 : index
    %c0_121 = arith.constant 0 : index
    %c0_122 = arith.constant 0 : index
    %110 = vector.load %arg2[%c3_120, %c0_121, %c0_122] : memref<5x128x128xf32, #tpu.memory_space<vmem>>, vector<1x128x128xf32>
    %111 = vector.shape_cast %110 : vector<1x128x128xf32> to vector<128x128xf32>
    %cst_123 = arith.constant dense<0.000000e+00> : vector<8x128xf32>
    %112 = tpu.matmul %105, %111, %cst_123 {dimension_numbers = #tpu.dot_dimension_numbers<[1], [0], [0], [1], [0, 0, 1, 1], [], []>} : vector<8x128xf32>, vector<128x128xf32>, vector<8x128xf32> -> vector<8x128xf32>
    %113 = arith.addf %103, %112 : vector<8x128xf32>
    %c1_124 = arith.constant 1 : index
    %c1_125 = arith.constant 1 : index
    %c2_126 = arith.constant 2 : index
    %c0_127 = arith.constant 0 : index
    %114 = vector.load %arg1[%c1_124, %c1_125, %c2_126, %c0_127] : memref<2x2x10x128xf32, #tpu.memory_space<vmem>>, vector<1x1x8x128xf32>
    %115 = vector.shape_cast %114 : vector<1x1x8x128xf32> to vector<8x128xf32>
    %c4_128 = arith.constant 4 : index
    %c0_129 = arith.constant 0 : index
    %c0_130 = arith.constant 0 : index
    %116 = vector.load %arg2[%c4_128, %c0_129, %c0_130] : memref<5x128x128xf32, #tpu.memory_space<vmem>>, vector<1x128x128xf32>
    %117 = vector.shape_cast %116 : vector<1x128x128xf32> to vector<128x128xf32>
    %cst_131 = arith.constant dense<0.000000e+00> : vector<8x128xf32>
    %118 = tpu.matmul %115, %117, %cst_131 {dimension_numbers = #tpu.dot_dimension_numbers<[1], [0], [0], [1], [0, 0, 1, 1], [], []>} : vector<8x128xf32>, vector<128x128xf32>, vector<8x128xf32> -> vector<8x128xf32>
    %119 = arith.addf %113, %118 : vector<8x128xf32>
    %120 = arith.maximumf %109, %119 : vector<8x128xf32>
    %121 = vector.extract_strided_slice %120 {offsets = [0, 0], sizes = [8, 64], strides = [1, 1]} : vector<8x128xf32> to vector<8x64xf32>
    %122 = vector.extract_strided_slice %120 {offsets = [0, 64], sizes = [8, 64], strides = [1, 1]} : vector<8x128xf32> to vector<8x64xf32>
    %123 = arith.maximumf %121, %122 : vector<8x64xf32>
    %c0_132 = arith.constant 0 : index
    %c0_133 = arith.constant 0 : index
    %124 = vector.load %arg3[%c0_132, %c0_133] : memref<1x64xf32, #tpu.memory_space<vmem>>, vector<1x64xf32>
    %125 = vector.broadcast %124 : vector<1x64xf32> to vector<8x64xf32>
    %126 = arith.addf %123, %125 : vector<8x64xf32>
    %cst_134 = arith.constant 0.000000e+00 : f32
    %127 = vector.broadcast %cst_134 : f32 to vector<8x64xf32>
    %128 = arith.maximumf %126, %127 : vector<8x64xf32>
    %c1_135 = arith.constant 1 : index
    %c0_136 = arith.constant 0 : index
    %c0_137 = arith.constant 0 : index
    %129 = vector.load %arg4[%c1_135, %c0_136, %c0_137] : memref<2x8x64xf32, #tpu.memory_space<vmem>>, vector<1x8x64xf32>
    %130 = vector.shape_cast %129 : vector<1x8x64xf32> to vector<8x64xf32>
    %131 = vector.shape_cast %128 : vector<8x64xf32> to vector<1x8x64xf32>
    tpu.vector_store %arg4[%c1_135, %c0_136, %c0_137], %131 {strides = array<i32>} : memref<2x8x64xf32, #tpu.memory_space<vmem>>, vector<1x8x64xf32>,
    return
  }
  func.func @transform_0(%arg0: i32) -> (i32, i32, i32, i32) {
    %c0_i32 = arith.constant 0 : i32
    %c0_i32_0 = arith.constant 0 : i32
    %c0_i32_1 = arith.constant 0 : i32
    %c0_i32_2 = arith.constant 0 : i32
    return %arg0, %c0_i32, %c0_i32_0, %c0_i32_1 : i32, i32, i32, i32
  }
  func.func @transform_1(%arg0: i32) -> (i32, i32, i32) {
    %c0_i32 = arith.constant 0 : i32
    %c0_i32_0 = arith.constant 0 : i32
    %c0_i32_1 = arith.constant 0 : i32
    %c0_i32_2 = arith.constant 0 : i32
    return %c0_i32, %c0_i32_0, %c0_i32_1 : i32, i32, i32
  }
  func.func @transform_2(%arg0: i32) -> (i32, i32) {
    %c0_i32 = arith.constant 0 : i32
    %c0_i32_0 = arith.constant 0 : i32
    %c0_i32_1 = arith.constant 0 : i32
    return %c0_i32, %c0_i32_0 : i32, i32
  }
  func.func @transform_3(%arg0: i32) -> (i32, i32, i32) {
    %c0_i32 = arith.constant 0 : i32
    %c0_i32_0 = arith.constant 0 : i32
    %c0_i32_1 = arith.constant 0 : i32
    return %arg0, %c0_i32, %c0_i32_0 : i32, i32, i32
  }
}

</mosaic_0001>

<bundles_post_ra>
// kernel: tile.8
= control target key start
LH: loop header
LB: loop body
LE: loop exit
PB: predicated region body
PF: predicated region fallthrough
CT: control target
= control target key end

     0   :  { %s22_s0 = inlined_call_operand.vmem [shape: f32[8], index: 0, kind: input, shape index: {}]   ;;  %s23_s1 = inlined_call_operand.vmem [shape: f32[8,8], index: 1, kind: output, shape index: {}]  }
   0x1   :  { %v4_v0 = vld [vmem:[%s22_s0] ss:$0 sm:$0xff] }
   0x2   :  { %5 = vst [vmem:[%s23_s1] sm:$0xff] %v4_v0 }

// kernel: tile.9
= control target key start
LH: loop header
LB: loop body
LE: loop exit
PB: predicated region body
PF: predicated region fallthrough
CT: control target
= control target key end

     0   :  { %s67_s10 = smov 56   ;;  %s68_s11 = smov 40   ;;  %vm3_vm0 = vcmask 64512   ;;  %vm9_vm1 = vcmask 523712   ;;  %vm15_vm2 = vcmask 458112   ;;  %vm21_vm3 = vcmask 392512   ;;  %s111_s0 = inlined_call_operand.vmem [shape: f32[8,8], index: 0, kind: input, shape index: {}]   ;;  %s112_s1 = inlined_call_operand.vmem [shape: f32[1,64], index: 1, kind: output, shape index: {}]  }
   0x1   :  { %v53_v0 = vld [vmem:[%s111_s0 + $0x7] sm:$0x1]   ;;  %v55_v1 = vld [vmem:[%s111_s0 + $0x5] sm:$0x1]   ;;  %v57_v2 = vld [vmem:[%s111_s0 + $0x3] sm:$0x1]  }
   0x2   :  { %7 = vrot.lane.b32.xlu0 %v53_v0, %s67_s10  ;;  %19 = vrot.lane.b32.xlu1 %v55_v1, %s68_s11  ;;  %s69_s14 = smov 24   ;;  %v54_v3 = vld [vmem:[%s111_s0 + $0x6] sm:$0x1]   ;;  %v56_v4 = vld [vmem:[%s111_s0 + $0x4] sm:$0x1]   ;;  %s70_s21 = smov 48  }
   0x3   :  { %31 = vrot.lane.b32.xlu2 %v57_v2, %s69_s14  ;;  %v58_v5 = vld [vmem:[%s111_s0 + $0x2] sm:$0x1]   ;;  %s71_s22 = smov 32   ;;  %s72_s23 = smov 16   ;;  %v59_v6 = vld [vmem:[%s111_s0 + $0x1] sm:$0x1]  }
   0x4   :  { %s73_s26 = smov 8   ;;  %v2_v7 = vld [vmem:[%s111_s0] sm:$0x1]   ;;  %vm27_vm4 = vcmask 326912   ;;  %vm33_vm5 = vcmask 261312   ;;  %vm39_vm6 = vcmask 195712  }
   0x5   :  { %4 = vst.msk [vmem:[#allocation0] sm:$0x1] %vm3_vm0, %v2_v7   ;;  %vm45_vm7 = vcmask 130112  }
   0xa   :  { %13 = vrot.lane.b32.xlu0 %v54_v3, %s70_s21  ;;  %25 = vrot.lane.b32.xlu1 %v56_v4, %s71_s22 }
   0xb   :  { %37 = vrot.lane.b32.xlu2 %v58_v5, %s72_s23 }
  0x12   :  { %43 = vrot.lane.b32.xlu0 %v59_v6, %s73_s26 }
  0x5d   :  { %v32_v8 = vpop.permute.xlu2 %31  }
  0x65   :  { %v38_v9 = vpop.permute.xlu2 %37  }
  0x74   :  { %v8_v10 = vpop.permute.xlu0 %7   ;;  %v20_v11 = vpop.permute.xlu1 %19  }
  0x75   :  { %10 = vst.msk [vmem:[#allocation0] sm:$0x1] %vm9_vm1, %v8_v10  }
  0x7c   :  { %v14_v12 = vpop.permute.xlu0 %13   ;;  %v26_v13 = vpop.permute.xlu1 %25  }
  0x7d   :  { %16 = vst.msk [vmem:[#allocation0] sm:$0x1] %vm15_vm2, %v14_v12  }
  0x7e   :  { %22 = vst.msk [vmem:[#allocation0] sm:$0x1] %vm21_vm3, %v20_v11  }
  0x7f   :  { %28 = vst.msk [vmem:[#allocation0] sm:$0x1] %vm27_vm4, %v26_v13  }
  0x80   :  { %34 = vst.msk [vmem:[#allocation0] sm:$0x1] %vm33_vm5, %v32_v8  }
  0x81   :  { %40 = vst.msk [vmem:[#allocation0] sm:$0x1] %vm39_vm6, %v38_v9  }
  0x84   :  { %v44_v14 = vpop.permute.xlu0 %43  }
  0x85   :  { %46 = vst.msk [vmem:[#allocation0] sm:$0x1] %vm45_vm7, %v44_v14  }
  0x8c   :  { %v49_v15 = vld [vmem:[#allocation0] sm:$0x1] }
  0x8d   :  { %52 = vst [vmem:[%s112_s1] sm:$0x1] %v49_v15 }

// kernel: _lambda_.1
= control target key start
LH: loop header
LB: loop body
LE: loop exit
PB: predicated region body
PF: predicated region fallthrough
CT: control target
= control target key end

     0   :  { %vm323_vm0 = vcmask 523264   ;;  %s1575_s1 = inlined_call_operand.vmem [shape: f32[5,128,128], index: 1, kind: input, shape index: {}]   ;;  %s1576_s0 = inlined_call_operand.vmem [shape: f32[2,2,10,128], index: 0, kind: input, shape index: {}]   ;;  %s1577_s2 = inlined_call_operand.vmem [shape: f32[1,64], index: 2, kind: input, shape index: {}]   ;;  %s1578_s3 = inlined_call_operand.vmem [shape: f32[2,8,64], index: 3, kind: output, shape index: {}]  }
   0x1   :  { %v802_v0 = vld [vmem:[%s1575_s1 + $0xf8] sm:$0xff]  ;;  %v819_v3 = vld [vmem:[%s1575_s1 + $0xf0] sm:$0xff]  ;;  %v836_v6 = vld [vmem:[%s1575_s1 + $0xe8] sm:$0xff] }
   0x2   :  { %v807_v1 = vld [vmem:[%s1575_s1 + $0x78] sm:$0xff]  ;;  %50 = vmatpush.msra.mxu0 %v802_v0  ;;  %v824_v4 = vld [vmem:[%s1575_s1 + $0x70] sm:$0xff]  ;;  %129 = vmatpush.msra.mxu3 %v802_v0  ;;  %v841_v7 = vld [vmem:[%s1575_s1 + $0x68] sm:$0xff] }
   0x3   :  { %v812_v2 = vld [vmem:[%s1575_s1 + $0x178] sm:$0xff]  ;;  %70 = vmatpush.msra.mxu1 %v807_v1  ;;  %v829_v5 = vld [vmem:[%s1575_s1 + $0x170] sm:$0xff]  ;;  %v848_v8 = vld [vmem:[%s1575_s1 + $0x168] sm:$0xff] }
   0x4   :  { %1627 = vst [vmem:[#allocation2_spill] sm:$0xff] %v812_v2  ;;  %108 = vmatpush.msra.mxu2 %v812_v2  ;;  %51 = vmatpush.msra.mxu0 %v819_v3  ;;  %v855_v9 = vld [vmem:[%s1575_s1 + $0xe0] sm:$0xff]  ;;  %v874_v12 = vld [vmem:[%s1575_s1 + $0xd8] sm:$0xff]  ;;  %v893_v15 = vld [vmem:[%s1575_s1 + $0xd0] sm:$0xff] }
   0x5   :  { %1628 = vst [vmem:[#allocation3_spill] sm:$0xff] %v829_v5  ;;  %71 = vmatpush.msra.mxu1 %v824_v4  ;;  %130 = vmatpush.msra.mxu3 %v819_v3  ;;  %v860_v10 = vld [vmem:[%s1575_s1 + $0x60] sm:$0xff]  ;;  %v879_v13 = vld [vmem:[%s1575_s1 + $0x58] sm:$0xff]  ;;  %v898_v16 = vld [vmem:[%s1575_s1 + $0x50] sm:$0xff] }
   0x6   :  { %1629 = vst [vmem:[#allocation4_spill] sm:$0xff] %v848_v8  ;;  %109 = vmatpush.msra.mxu2 %v829_v5  ;;  %52 = vmatpush.msra.mxu0 %v836_v6  ;;  %v867_v11 = vld [vmem:[%s1575_s1 + $0x160] sm:$0xff]  ;;  %v886_v14 = vld [vmem:[%s1575_s1 + $0x158] sm:$0xff]  ;;  %v905_v17 = vld [vmem:[%s1575_s1 + $0x150] sm:$0xff] }
   0x7   :  { %72 = vmatpush.msra.mxu1 %v841_v7  ;;  %1630 = vst [vmem:[#allocation5_spill] sm:$0xff] %v867_v11  ;;  %131 = vmatpush.msra.mxu3 %v836_v6  ;;  %v912_v18 = vld [vmem:[%s1575_s1 + $0xc8] sm:$0xff]  ;;  %v931_v21 = vld [vmem:[%s1575_s1 + $0xc0] sm:$0xff]  ;;  %v950_v24 = vld [vmem:[%s1575_s1 + $0xb8] sm:$0xff] }
   0x8   :  { %110 = vmatpush.msra.mxu2 %v848_v8  ;;  %53 = vmatpush.msra.mxu0 %v855_v9  ;;  %1631 = vst [vmem:[#allocation6_spill] sm:$0xff] %v886_v14  ;;  %v917_v19 = vld [vmem:[%s1575_s1 + $0x48] sm:$0xff]  ;;  %v936_v22 = vld [vmem:[%s1575_s1 + $0x40] sm:$0xff]  ;;  %v955_v25 = vld [vmem:[%s1575_s1 + $0x38] sm:$0xff] }
   0x9   :  { %73 = vmatpush.msra.mxu1 %v860_v10  ;;  %132 = vmatpush.msra.mxu3 %v855_v9  ;;  %1632 = vst [vmem:[#allocation7_spill] sm:$0xff] %v905_v17  ;;  %v924_v20 = vld [vmem:[%s1575_s1 + $0x148] sm:$0xff]  ;;  %v943_v23 = vld [vmem:[%s1575_s1 + $0x140] sm:$0xff]  ;;  %v962_v26 = vld [vmem:[%s1575_s1 + $0x138] sm:$0xff] }
   0xa   :  { %111 = vmatpush.msra.mxu2 %v867_v11  ;;  %54 = vmatpush.msra.mxu0 %v874_v12  ;;  %1633 = vst [vmem:[#allocation8_spill] sm:$0xff] %v924_v20  ;;  %v969_v27 = vld [vmem:[%s1575_s1 + $0xb0] sm:$0xff]  ;;  %v988_v30 = vld [vmem:[%s1575_s1 + $0xa8] sm:$0xff]  ;;  %v1007_v33 = vld [vmem:[%s1575_s1 + $0xa0] sm:$0xff] }
   0xb   :  { %74 = vmatpush.msra.mxu1 %v879_v13  ;;  %133 = vmatpush.msra.mxu3 %v874_v12  ;;  %1634 = vst [vmem:[#allocation9_spill] sm:$0xff] %v943_v23  ;;  %v974_v28 = vld [vmem:[%s1575_s1 + $0x30] sm:$0xff]  ;;  %v993_v31 = vld [vmem:[%s1575_s1 + $0x28] sm:$0xff]  ;;  %v1012_v34 = vld [vmem:[%s1575_s1 + $0x20] sm:$0xff] }
   0xc   :  { %112 = vmatpush.msra.mxu2 %v886_v14  ;;  %55 = vmatpush.msra.mxu0 %v893_v15  ;;  %1635 = vst [vmem:[#allocation10_spill] sm:$0xff] %v962_v26  ;;  %v981_v29 = vld [vmem:[%s1575_s1 + $0x130] sm:$0xff]  ;;  %v1000_v32 = vld [vmem:[%s1575_s1 + $0x128] sm:$0xff]  ;;  %v1019_v35 = vld [vmem:[%s1575_s1 + $0x120] sm:$0xff] }
   0xd   :  { %75 = vmatpush.msra.mxu1 %v898_v16  ;;  %134 = vmatpush.msra.mxu3 %v893_v15  ;;  %1636 = vst [vmem:[#allocation11_spill] sm:$0xff] %v981_v29  ;;  %v1026_v36 = vld [vmem:[%s1575_s1 + $0x98] sm:$0xff]  ;;  %v1045_v39 = vld [vmem:[%s1575_s1 + $0x90] sm:$0xff]  ;;  %v1064_v42 = vld [vmem:[%s1575_s1 + $0x88] sm:$0xff] }
   0xe   :  { %113 = vmatpush.msra.mxu2 %v905_v17  ;;  %56 = vmatpush.msra.mxu0 %v912_v18  ;;  %1637 = vst [vmem:[#allocation12_spill] sm:$0xff] %v1000_v32  ;;  %v1031_v37 = vld [vmem:[%s1575_s1 + $0x18] sm:$0xff]  ;;  %v1050_v40 = vld [vmem:[%s1575_s1 + $0x10] sm:$0xff]  ;;  %v1069_v43 = vld [vmem:[%s1575_s1 + $0x8] sm:$0xff] }
   0xf   :  { %76 = vmatpush.msra.mxu1 %v917_v19  ;;  %135 = vmatpush.msra.mxu3 %v912_v18  ;;  %1638 = vst [vmem:[#allocation13_spill] sm:$0xff] %v1019_v35  ;;  %v1038_v38 = vld [vmem:[%s1575_s1 + $0x118] sm:$0xff]  ;;  %v1057_v41 = vld [vmem:[%s1575_s1 + $0x110] sm:$0xff]  ;;  %v1076_v44 = vld [vmem:[%s1575_s1 + $0x108] sm:$0xff] }
  0x10   :  { %114 = vmatpush.msra.mxu2 %v924_v20  ;;  %57 = vmatpush.msra.mxu0 %v931_v21  ;;  %1639 = vst [vmem:[#allocation14_spill] sm:$0xff] %v1038_v38  ;;  %v1083_v45 = vld [vmem:[%s1575_s1 + $0x80] sm:$0xff]  ;;  %v1102_v48 = vld [vmem:[%s1575_s1 + $0x1f8] sm:$0xff]  ;;  %v1111_v49 = vld [vmem:[%s1575_s1 + $0x1f0] sm:$0xff] }
  0x11   :  { %77 = vmatpush.msra.mxu1 %v936_v22  ;;  %136 = vmatpush.msra.mxu3 %v931_v21  ;;  %1640 = vst [vmem:[#allocation15_spill] sm:$0xff] %v1050_v40  ;;  %v1088_v46 = vld [vmem:[%s1575_s1] sm:$0xff]  ;;  %v1118_v50 = vld [vmem:[%s1575_s1 + $0x278] sm:$0xff]  ;;  %v1125_v51 = vld [vmem:[%s1575_s1 + $0x1e8] sm:$0xff] }
  0x12   :  { %115 = vmatpush.msra.mxu2 %v943_v23  ;;  %58 = vmatpush.msra.mxu0 %v950_v24  ;;  %1641 = vst [vmem:[#allocation16_spill] sm:$0xff] %v1057_v41  ;;  %v1095_v47 = vld [vmem:[%s1575_s1 + $0x100] sm:$0xff]  ;;  %v1132_v52 = vld [vmem:[%s1575_s1 + $0x270] sm:$0xff]  ;;  %v1146_v54 = vld [vmem:[%s1575_s1 + $0x268] sm:$0xff] }
  0x13   :  { %78 = vmatpush.msra.mxu1 %v955_v25  ;;  %137 = vmatpush.msra.mxu3 %v950_v24  ;;  %1642 = vst [vmem:[#allocation17_spill] sm:$0xff] %v1069_v43  ;;  %v1139_v53 = vld [vmem:[%s1575_s1 + $0x1e0] sm:$0xff]  ;;  %v1153_v55 = vld [vmem:[%s1575_s1 + $0x1d8] sm:$0xff]  ;;  %v1167_v57 = vld [vmem:[%s1575_s1 + $0x1d0] sm:$0xff] }
  0x14   :  { %116 = vmatpush.msra.mxu2 %v962_v26  ;;  %59 = vmatpush.msra.mxu0 %v969_v27  ;;  %1643 = vst [vmem:[#allocation18_spill] sm:$0xff] %v1076_v44  ;;  %v1160_v56 = vld [vmem:[%s1575_s1 + $0x260] sm:$0xff]  ;;  %v1174_v58 = vld [vmem:[%s1575_s1 + $0x258] sm:$0xff]  ;;  %v1181_v59 = vld [vmem:[%s1575_s1 + $0x1c8] sm:$0xff] }
  0x15   :  { %79 = vmatpush.msra.mxu1 %v974_v28  ;;  %138 = vmatpush.msra.mxu3 %v969_v27  ;;  %1644 = vst [vmem:[#allocation19_spill] sm:$0xff] %v1083_v45  ;;  %v1188_v60 = vld [vmem:[%s1575_s1 + $0x250] sm:$0xff]  ;;  %v1195_v61 = vld [vmem:[%s1575_s1 + $0x1c0] sm:$0xff]  ;;  %v1202_v62 = vld [vmem:[%s1575_s1 + $0x248] sm:$0xff] }
  0x16   :  { %117 = vmatpush.msra.mxu2 %v981_v29  ;;  %60 = vmatpush.msra.mxu0 %v988_v30  ;;  %1645 = vst [vmem:[#allocation20_spill] sm:$0xff] %v1088_v46  ;;  %v1209_v63 = vld [vmem:[%s1575_s1 + $0x1b8] sm:$0xff] }
  0x17   :  { %80 = vmatpush.msra.mxu1 %v993_v31  ;;  %139 = vmatpush.msra.mxu3 %v988_v30  ;;  %1646 = vst [vmem:[#allocation21_spill] sm:$0xff] %v1095_v47 }
  0x18   :  { %118 = vmatpush.msra.mxu2 %v1000_v32  ;;  %61 = vmatpush.msra.mxu0 %v1007_v33 }
  0x19   :  { %81 = vmatpush.msra.mxu1 %v1012_v34  ;;  %140 = vmatpush.msra.mxu3 %v1007_v33 }
  0x1a   :  { %119 = vmatpush.msra.mxu2 %v1019_v35  ;;  %62 = vmatpush.msra.mxu0 %v1026_v36 }
  0x1b   :  { %82 = vmatpush.msra.mxu1 %v1031_v37  ;;  %141 = vmatpush.msra.mxu3 %v1026_v36 }
  0x1c   :  { %120 = vmatpush.msra.mxu2 %v1038_v38  ;;  %63 = vmatpush.msra.mxu0 %v1045_v39 }
  0x1d   :  { %83 = vmatpush.msra.mxu1 %v1050_v40  ;;  %142 = vmatpush.msra.mxu3 %v1045_v39 }
  0x1e   :  { %121 = vmatpush.msra.mxu2 %v1057_v41  ;;  %64 = vmatpush.msra.mxu0 %v1064_v42 }
  0x1f   :  { %84 = vmatpush.msra.mxu1 %v1069_v43  ;;  %143 = vmatpush.msra.mxu3 %v1064_v42 }
  0x20   :  { %122 = vmatpush.msra.mxu2 %v1076_v44  ;;  %65 = vmatpush.msra.mxu0 %v1083_v45 }
  0x21   :  { %85 = vmatpush.msra.mxu1 %v1088_v46  ;;  %144 = vmatpush.msra.mxu3 %v1083_v45  ;;  %v1304_v45 = vld [vmem:[%s1575_s1 + $0x210] sm:$0xff] }
  0x22   :  { %123 = vmatpush.msra.mxu2 %v1095_v47  ;;  %149 = vmatpush.msrb.mxu0 %v807_v1  ;;  %1648 = vst [vmem:[#allocation23_spill] sm:$0xff] %v1304_v45 }
  0x23   :  { %187 = vmatpush.msrb.mxu1 %v1102_v48  ;;  %247 = vmatpush.msrb.mxu3 %v1118_v50 }
  0x24   :  { %208 = vmatpush.msrb.mxu2 %v812_v2  ;;  %150 = vmatpush.msrb.mxu0 %v824_v4  ;;  %v90_v2 = vld [vmem:[%s1576_s0 + $0x1] sm:$0xff] }
  0x25   :  { %188 = vmatpush.msrb.mxu1 %v1111_v49  ;;  %248 = vmatpush.msrb.mxu3 %v1132_v52 }
  0x26   :  { %209 = vmatpush.msrb.mxu2 %v829_v5  ;;  %151 = vmatpush.msrb.mxu0 %v841_v7  ;;  %v1279_v5 = vld [vmem:[%s1575_s1 + $0x190] sm:$0xff] }
  0x27   :  { %189 = vmatpush.msrb.mxu1 %v1125_v51  ;;  %249 = vmatpush.msrb.mxu3 %v1146_v54 }
  0x28   :  { %210 = vmatpush.msrb.mxu2 %v848_v8  ;;  %152 = vmatpush.msrb.mxu0 %v860_v10  ;;  %v1265_v8 = vld [vmem:[%s1575_s1 + $0x198] sm:$0xff] }
  0x29   :  { %190 = vmatpush.msrb.mxu1 %v1139_v53  ;;  %250 = vmatpush.msrb.mxu3 %v1160_v56 }
  0x2a   :  { %211 = vmatpush.msrb.mxu2 %v867_v11  ;;  %153 = vmatpush.msrb.mxu0 %v879_v13  ;;  %v1251_v11 = vld [vmem:[%s1575_s1 + $0x1a0] sm:$0xff] }
  0x2b   :  { %191 = vmatpush.msrb.mxu1 %v1153_v55  ;;  %251 = vmatpush.msrb.mxu3 %v1174_v58 }
  0x2c   :  { %212 = vmatpush.msrb.mxu2 %v886_v14  ;;  %154 = vmatpush.msrb.mxu0 %v898_v16  ;;  %v1237_v14 = vld [vmem:[%s1575_s1 + $0x1a8] sm:$0xff] }
  0x2d   :  { %192 = vmatpush.msrb.mxu1 %v1167_v57  ;;  %252 = vmatpush.msrb.mxu3 %v1188_v60 }
  0x2e   :  { %213 = vmatpush.msrb.mxu2 %v905_v17  ;;  %155 = vmatpush.msrb.mxu0 %v917_v19  ;;  %v1223_v17 = vld [vmem:[%s1575_s1 + $0x1b0] sm:$0xff] }
  0x2f   :  { %193 = vmatpush.msrb.mxu1 %v1181_v59  ;;  %253 = vmatpush.msrb.mxu3 %v1202_v62 }
  0x30   :  { %214 = vmatpush.msrb.mxu2 %v924_v20  ;;  %156 = vmatpush.msrb.mxu0 %v936_v22  ;;  %v1216_v20 = vld [vmem:[%s1575_s1 + $0x240] sm:$0xff] }
  0x31   :  { %194 = vmatpush.msrb.mxu1 %v1195_v61  ;;  %254 = vmatpush.msrb.mxu3 %v1216_v20 }
  0x32   :  { %215 = vmatpush.msrb.mxu2 %v943_v23  ;;  %157 = vmatpush.msrb.mxu0 %v955_v25  ;;  %v1230_v23 = vld [vmem:[%s1575_s1 + $0x238] sm:$0xff] }
  0x33   :  { %195 = vmatpush.msrb.mxu1 %v1209_v63  ;;  %255 = vmatpush.msrb.mxu3 %v1230_v23 }
  0x34   :  { %216 = vmatpush.msrb.mxu2 %v962_v26  ;;  %158 = vmatpush.msrb.mxu0 %v974_v28  ;;  %v1244_v26 = vld [vmem:[%s1575_s1 + $0x230] sm:$0xff] }
  0x35   :  { %196 = vmatpush.msrb.mxu1 %v1223_v17  ;;  %256 = vmatpush.msrb.mxu3 %v1244_v26 }
  0x36   :  { %217 = vmatpush.msrb.mxu2 %v981_v29  ;;  %159 = vmatpush.msrb.mxu0 %v993_v31  ;;  %v1258_v29 = vld [vmem:[%s1575_s1 + $0x228] sm:$0xff] }
  0x37   :  { %197 = vmatpush.msrb.mxu1 %v1237_v14  ;;  %257 = vmatpush.msrb.mxu3 %v1258_v29 }
  0x38   :  { %218 = vmatpush.msrb.mxu2 %v1000_v32  ;;  %160 = vmatpush.msrb.mxu0 %v1012_v34  ;;  %v1272_v32 = vld [vmem:[%s1575_s1 + $0x220] sm:$0xff] }
  0x39   :  { %198 = vmatpush.msrb.mxu1 %v1251_v11  ;;  %258 = vmatpush.msrb.mxu3 %v1272_v32 }
  0x3a   :  { %219 = vmatpush.msrb.mxu2 %v1019_v35  ;;  %161 = vmatpush.msrb.mxu0 %v1031_v37  ;;  %v1286_v35 = vld [vmem:[%s1575_s1 + $0x218] sm:$0xff] }
  0x3b   :  { %199 = vmatpush.msrb.mxu1 %v1265_v8  ;;  %1647 = vst [vmem:[#allocation22_spill] sm:$0xff] %v1286_v35  ;;  %259 = vmatpush.msrb.mxu3 %v1286_v35 }
  0x3c   :  { %220 = vmatpush.msrb.mxu2 %v1038_v38  ;;  %162 = vmatpush.msrb.mxu0 %v1050_v40  ;;  %v1298_v38 = vld [vmem:[%s1575_s1 + $0x188] sm:$0xff] }
  0x3d   :  { %200 = vmatpush.msrb.mxu1 %v1279_v5  ;;  %124 = vmatmul.f32.vlgmr.msra.gmra.mxu2 %v90_v2  ;;  %v1317_v40 = vld [vmem:[%s1575_s1 + $0x208] sm:$0xff] }
  0x3e   :  { %221 = vmatpush.msrb.mxu2 %v1057_v41  ;;  %145 = vmatmul.f32.vlgmr.msra.gmra.mxu3 %v90_v2  ;;  %v1310_v41 = vld [vmem:[%s1575_s1 + $0x180] sm:$0xff]  ;;  %1649 = vst [vmem:[#allocation24_spill] sm:$0xff] %v1317_v40  ;;  %v637_v2 = vld [vmem:[%s1576_s0 + $0x10] sm:$0xff] }
  0x3f   :  { %163 = vmatpush.msrb.mxu0 %v1069_v43  ;;  %201 = vmatpush.msrb.mxu1 %v1298_v38  ;;  %v14_v43 = vld [vmem:[%s1576_s0] sm:$0xff] }
  0x40   :  { %222 = vmatpush.msrb.mxu2 %v1076_v44  ;;  %260 = vmatpush.msrb.mxu3 %v1304_v45  ;;  %v1333_v44 = vld [vmem:[%s1575_s1 + $0x200] sm:$0xff] }
  0x41   :  { %164 = vmatpush.msrb.mxu0 %v1088_v46  ;;  %202 = vmatpush.msrb.mxu1 %v1310_v41  ;;  %1650 = vst [vmem:[#allocation25_spill] sm:$0xff] %v1333_v44  ;;  %v670_v46 = vld [vmem:[%s1576_s0 + $0x11] sm:$0xff] }
  0x42   :  { %223 = vmatpush.msrb.mxu2 %v1095_v47  ;;  %261 = vmatpush.msrb.mxu3 %v1317_v40  ;;  %v1346_v47 = vld [vmem:[%s1576_s0 + $0x2] sm:$0xff] }
  0x43   :  { %66 = vmatmul.f32.vlgmr.msra.gmra.mxu0 %v637_v2  ;;  %86 = vmatmul.f32.vlgmr.msra.gmra.mxu1 %v14_v43  ;;  %v1651_v43 = vld [vmem:[#allocation15_spill] sm:$0xff] }
  0x44   :  { %268 = vmatpush.msra.mxu0 %v1102_v48  ;;  %290 = vmatpush.msra.mxu1 %v1118_v50 }
  0x45   :  { %361 = vmatpush.msra.mxu2 %v802_v0  ;;  %262 = vmatpush.msrb.mxu3 %v1333_v44 }
  0x46   :  { %269 = vmatpush.msra.mxu0 %v1111_v49  ;;  %291 = vmatpush.msra.mxu1 %v1132_v52 }
  0x47   :  { %362 = vmatpush.msra.mxu2 %v819_v3  ;;  %381 = vmatpush.msra.mxu3 %v807_v1 }
  0x48   :  { %224 = vmatmul.f32.vlgmr.msrb.gmra.mxu2 %v670_v46  ;;  %263 = vmatmul.f32.vlgmr.msrb.gmra.mxu3 %v1346_v47 }
  0x49   :  { %270 = vmatpush.msra.mxu0 %v1125_v51  ;;  %292 = vmatpush.msra.mxu1 %v1146_v54 }
  0x4a   :  { %363 = vmatpush.msra.mxu2 %v836_v6  ;;  %382 = vmatpush.msra.mxu3 %v824_v4 }
  0x4b   :  { %271 = vmatpush.msra.mxu0 %v1139_v53  ;;  %293 = vmatpush.msra.mxu1 %v1160_v56 }
  0x4c   :  { %364 = vmatpush.msra.mxu2 %v855_v9  ;;  %383 = vmatpush.msra.mxu3 %v841_v7 }
  0x4d   :  { %165 = vmatmul.f32.vlgmr.msrb.gmra.mxu0 %v637_v2  ;;  %203 = vmatmul.f32.vlgmr.msrb.gmra.mxu1 %v670_v46  ;;  %v1652_v46 = vld [vmem:[#allocation19_spill] sm:$0xff]  ;;  %v1653_v2 = vld [vmem:[#allocation17_spill] sm:$0xff] }
  0x4e   :  { %272 = vmatpush.msra.mxu0 %v1153_v55  ;;  %294 = vmatpush.msra.mxu1 %v1174_v58 }
  0x4f   :  { %365 = vmatpush.msra.mxu2 %v874_v12  ;;  %384 = vmatpush.msra.mxu3 %v860_v10 }
  0x50   :  { %273 = vmatpush.msra.mxu0 %v1167_v57  ;;  %295 = vmatpush.msra.mxu1 %v1188_v60 }
  0x51   :  { %366 = vmatpush.msra.mxu2 %v893_v15  ;;  %385 = vmatpush.msra.mxu3 %v879_v13 }
  0x52   :  { %274 = vmatpush.msra.mxu0 %v1181_v59  ;;  %296 = vmatpush.msra.mxu1 %v1202_v62 }
  0x53   :  { %367 = vmatpush.msra.mxu2 %v912_v18  ;;  %386 = vmatpush.msra.mxu3 %v898_v16 }
  0x54   :  { %275 = vmatpush.msra.mxu0 %v1195_v61  ;;  %297 = vmatpush.msra.mxu1 %v1216_v20 }
  0x55   :  { %368 = vmatpush.msra.mxu2 %v931_v21  ;;  %387 = vmatpush.msra.mxu3 %v917_v19 }
  0x56   :  { %276 = vmatpush.msra.mxu0 %v1209_v63  ;;  %298 = vmatpush.msra.mxu1 %v1230_v23 }
  0x57   :  { %369 = vmatpush.msra.mxu2 %v950_v24  ;;  %388 = vmatpush.msra.mxu3 %v936_v22 }
  0x58   :  { %277 = vmatpush.msra.mxu0 %v1223_v17  ;;  %299 = vmatpush.msra.mxu1 %v1244_v26 }
  0x59   :  { %370 = vmatpush.msra.mxu2 %v969_v27  ;;  %389 = vmatpush.msra.mxu3 %v955_v25 }
  0x5a   :  { %278 = vmatpush.msra.mxu0 %v1237_v14  ;;  %300 = vmatpush.msra.mxu1 %v1258_v29 }
  0x5b   :  { %371 = vmatpush.msra.mxu2 %v988_v30  ;;  %390 = vmatpush.msra.mxu3 %v974_v28 }
  0x5c   :  { %279 = vmatpush.msra.mxu0 %v1251_v11  ;;  %301 = vmatpush.msra.mxu1 %v1272_v32 }
  0x5d   :  { %372 = vmatpush.msra.mxu2 %v1007_v33  ;;  %391 = vmatpush.msra.mxu3 %v993_v31 }
  0x5e   :  { %280 = vmatpush.msra.mxu0 %v1265_v8  ;;  %302 = vmatpush.msra.mxu1 %v1286_v35  ;;  %v1654_v35 = vld [vmem:[#allocation2_spill] sm:$0xff] }
  0x5f   :  { %373 = vmatpush.msra.mxu2 %v1026_v36  ;;  %392 = vmatpush.msra.mxu3 %v1012_v34 }
  0x60   :  { %281 = vmatpush.msra.mxu0 %v1279_v5  ;;  %303 = vmatpush.msra.mxu1 %v1304_v45  ;;  %v703_v45 = vld [vmem:[%s1576_s0 + $0x12] sm:$0xff] }
  0x61   :  { %374 = vmatpush.msra.mxu2 %v1045_v39  ;;  %393 = vmatpush.msra.mxu3 %v1031_v37 }
  0x62   :  { %282 = vmatpush.msra.mxu0 %v1298_v38  ;;  %304 = vmatpush.msra.mxu1 %v1317_v40  ;;  %v1655_v40 = vld [vmem:[#allocation20_spill] sm:$0xff] }
  0x63   :  { %375 = vmatpush.msra.mxu2 %v1064_v42  ;;  %394 = vmatpush.msra.mxu3 %v1651_v43 }
  0x64   :  { %283 = vmatpush.msra.mxu0 %v1310_v41  ;;  %305 = vmatpush.msra.mxu1 %v1333_v44  ;;  %v1656_v44 = vld [vmem:[#allocation3_spill] sm:$0xff] }
  0x65   :  { %376 = vmatpush.msra.mxu2 %v1652_v46  ;;  %395 = vmatpush.msra.mxu3 %v1653_v2 }
  0x66   :  { %284 = vmatmul.f32.vlgmr.msra.gmra.mxu0 %v1346_v47  ;;  %439 = vmatpush.msrb.mxu1 %v802_v0  ;;  %v1657_v47 = vld [vmem:[#allocation4_spill] sm:$0xff]  ;;  %v1658_v0 = vld [vmem:[#allocation5_spill] sm:$0xff] }
  0x67   :  { %418 = vmatpush.msrb.mxu0 %v1654_v35  ;;  %459 = vmatpush.msrb.mxu2 %v807_v1  ;;  %v1659_v1 = vld [vmem:[#allocation6_spill] sm:$0xff] }
  0x68   :  { %396 = vmatpush.msra.mxu3 %v1655_v40  ;;  %306 = vmatmul.f32.vlgmr.msra.gmra.mxu1 %v703_v45 }
  0x69   :  { %419 = vmatpush.msrb.mxu0 %v1656_v44  ;;  %440 = vmatpush.msrb.mxu1 %v819_v3  ;;  %v1660_v3 = vld [vmem:[#allocation7_spill] sm:$0xff] }
  0x6a   :  { %460 = vmatpush.msrb.mxu2 %v824_v4  ;;  %496 = vmatpush.msrb.mxu3 %v1102_v48  ;;  %v1661_v4 = vld [vmem:[#allocation8_spill] sm:$0xff] }
  0x6b   :  { %420 = vmatpush.msrb.mxu0 %v1657_v47  ;;  %441 = vmatpush.msrb.mxu1 %v836_v6  ;;  %v1662_v6 = vld [vmem:[#allocation9_spill] sm:$0xff] }
  0x6c   :  { %461 = vmatpush.msrb.mxu2 %v841_v7  ;;  %497 = vmatpush.msrb.mxu3 %v1111_v49  ;;  %v1663_v7 = vld [vmem:[#allocation10_spill] sm:$0xff] }
  0x6d   :  { %421 = vmatpush.msrb.mxu0 %v1658_v0  ;;  %442 = vmatpush.msrb.mxu1 %v855_v9  ;;  %v1664_v9 = vld [vmem:[#allocation11_spill] sm:$0xff] }
  0x6e   :  { %462 = vmatpush.msrb.mxu2 %v860_v10  ;;  %498 = vmatpush.msrb.mxu3 %v1125_v51  ;;  %v1665_v10 = vld [vmem:[#allocation12_spill] sm:$0xff] }
  0x6f   :  { %422 = vmatpush.msrb.mxu0 %v1659_v1  ;;  %443 = vmatpush.msrb.mxu1 %v874_v12  ;;  %v1666_v12 = vld [vmem:[#allocation13_spill] sm:$0xff] }
  0x70   :  { %463 = vmatpush.msrb.mxu2 %v879_v13  ;;  %499 = vmatpush.msrb.mxu3 %v1139_v53  ;;  %v1667_v13 = vld [vmem:[#allocation14_spill] sm:$0xff] }
  0x71   :  { %423 = vmatpush.msrb.mxu0 %v1660_v3  ;;  %444 = vmatpush.msrb.mxu1 %v893_v15  ;;  %v1668_v15 = vld [vmem:[#allocation16_spill] sm:$0xff] }
  0x72   :  { %464 = vmatpush.msrb.mxu2 %v898_v16  ;;  %500 = vmatpush.msrb.mxu3 %v1153_v55  ;;  %v704_v16 = vld [vmem:[%s1576_s0 + $0x20] sm:$0xff] }
  0x73   :  { %424 = vmatpush.msrb.mxu0 %v1661_v4  ;;  %445 = vmatpush.msrb.mxu1 %v912_v18  ;;  %v1669_v18 = vld [vmem:[#allocation18_spill] sm:$0xff] }
  0x74   :  { %465 = vmatpush.msrb.mxu2 %v917_v19  ;;  %501 = vmatpush.msrb.mxu3 %v1167_v57  ;;  %v705_v19 = vld [vmem:[%s1576_s0 + $0x30] sm:$0xff] }
  0x75   :  { %425 = vmatpush.msrb.mxu0 %v1662_v6  ;;  %446 = vmatpush.msrb.mxu1 %v931_v21  ;;  %v1670_v21 = vld [vmem:[#allocation21_spill] sm:$0xff] }
  0x76   :  { %466 = vmatpush.msrb.mxu2 %v936_v22  ;;  %502 = vmatpush.msrb.mxu3 %v1181_v59  ;;  %v1490_v22 = vld [vmem:[%s1576_s0 + $0x31] sm:$0xff] }
  0x77   :  { %426 = vmatpush.msrb.mxu0 %v1663_v7  ;;  %447 = vmatpush.msrb.mxu1 %v950_v24  ;;  %v722_v24 = vld [vmem:[%s1576_s0 + $0x21] sm:$0xff] }
  0x78   :  { %467 = vmatpush.msrb.mxu2 %v955_v25  ;;  %503 = vmatpush.msrb.mxu3 %v1195_v61 }
  0x79   :  { %427 = vmatpush.msrb.mxu0 %v1664_v9  ;;  %448 = vmatpush.msrb.mxu1 %v969_v27 }
  0x7a   :  { %468 = vmatpush.msrb.mxu2 %v974_v28  ;;  %504 = vmatpush.msrb.mxu3 %v1209_v63 }
  0x7b   :  { %428 = vmatpush.msrb.mxu0 %v1665_v10  ;;  %449 = vmatpush.msrb.mxu1 %v988_v30 }
  0x7c   :  { %469 = vmatpush.msrb.mxu2 %v993_v31  ;;  %505 = vmatpush.msrb.mxu3 %v1223_v17 }
  0x7d   :  { %429 = vmatpush.msrb.mxu0 %v1666_v12  ;;  %450 = vmatpush.msrb.mxu1 %v1007_v33 }
  0x7e   :  { %470 = vmatpush.msrb.mxu2 %v1012_v34  ;;  %506 = vmatpush.msrb.mxu3 %v1237_v14 }
  0x7f   :  { %430 = vmatpush.msrb.mxu0 %v1667_v13  ;;  %451 = vmatpush.msrb.mxu1 %v1026_v36 }
  0x80   :  { %471 = vmatpush.msrb.mxu2 %v1031_v37  ;;  %507 = vmatpush.msrb.mxu3 %v1251_v11 }
  0x81   :  { %431 = vmatpush.msrb.mxu0 %v1668_v15  ;;  %452 = vmatpush.msrb.mxu1 %v1045_v39 }
  0x82   :  { %472 = vmatpush.msrb.mxu2 %v1651_v43  ;;  %508 = vmatpush.msrb.mxu3 %v1265_v8 }
  0x83   :  { %432 = vmatpush.msrb.mxu0 %v1669_v18  ;;  %397 = vmatmul.f32.vlgmr.msra.gmra.mxu3 %v704_v16 }
  0x84   :  { %453 = vmatpush.msrb.mxu1 %v1064_v42  ;;  %473 = vmatpush.msrb.mxu2 %v1653_v2 }
  0x85   :  { %509 = vmatpush.msrb.mxu3 %v1279_v5  ;;  %433 = vmatpush.msrb.mxu0 %v1670_v21 }
  0x86   :  { %454 = vmatpush.msrb.mxu1 %v1652_v46  ;;  %474 = vmatpush.msrb.mxu2 %v1655_v40  ;;  %v776_v46 = vld [vmem:[%s1577_s2] ss:$0 sm:$0xff] }
  0x87   :  { %510 = vmatpush.msrb.mxu3 %v1298_v38  ;;  %377 = vmatmul.f32.vlgmr.msra.gmra.mxu2 %v705_v19 }
  0x88   :  { %517 = vmatpush.msra.mxu0 %v1654_v35  ;;  %555 = vmatpush.msra.mxu1 %v1118_v50 }
  0x89   :  { %576 = vmatpush.msra.mxu2 %v1102_v48  ;;  %511 = vmatpush.msrb.mxu3 %v1310_v41 }
  0x8a   :  { %518 = vmatpush.msra.mxu0 %v1656_v44  ;;  %556 = vmatpush.msra.mxu1 %v1132_v52 }
  0x8b   :  { %577 = vmatpush.msra.mxu2 %v1111_v49  ;;  %598 = vmatpush.msra.mxu3 %v1118_v50 }
  0x8c   :  { %519 = vmatpush.msra.mxu0 %v1657_v47  ;;  %512 = vmatmul.f32.vlgmr.msrb.gmra.mxu3 %v1490_v22 }
  0x8d   :  { %557 = vmatpush.msra.mxu1 %v1146_v54  ;;  %578 = vmatpush.msra.mxu2 %v1125_v51 }
  0x8e   :  { %599 = vmatpush.msra.mxu3 %v1132_v52  ;;  %520 = vmatpush.msra.mxu0 %v1658_v0 }
  0x8f   :  { %558 = vmatpush.msra.mxu1 %v1160_v56  ;;  %579 = vmatpush.msra.mxu2 %v1139_v53 }
  0x90   :  { %600 = vmatpush.msra.mxu3 %v1146_v54  ;;  %434 = vmatmul.f32.vlgmr.msrb.gmra.mxu0 %v722_v24 }
  0x91   :  { %559 = vmatpush.msra.mxu1 %v1174_v58  ;;  %521 = vmatpush.msra.mxu0 %v1659_v1 }
  0x92   :  { %580 = vmatpush.msra.mxu2 %v1153_v55  ;;  %601 = vmatpush.msra.mxu3 %v1160_v56 }
  0x93   :  { %560 = vmatpush.msra.mxu1 %v1188_v60  ;;  %522 = vmatpush.msra.mxu0 %v1660_v3  ;;  %v777_v3 = vld [vmem:[%s1577_s2] ss:$0 sm:$0xff] }
  0x94   :  { %581 = vmatpush.msra.mxu2 %v1167_v57  ;;  %602 = vmatpush.msra.mxu3 %v1174_v58 }
  0x95   :  { %561 = vmatpush.msra.mxu1 %v1202_v62  ;;  %523 = vmatpush.msra.mxu0 %v1661_v4 }
  0x96   :  { %582 = vmatpush.msra.mxu2 %v1181_v59  ;;  %603 = vmatpush.msra.mxu3 %v1188_v60 }
  0x97   :  { %562 = vmatpush.msra.mxu1 %v1216_v20  ;;  %524 = vmatpush.msra.mxu0 %v1662_v6 }
  0x98   :  { %583 = vmatpush.msra.mxu2 %v1195_v61  ;;  %604 = vmatpush.msra.mxu3 %v1202_v62 }
  0x99   :  { %563 = vmatpush.msra.mxu1 %v1230_v23  ;;  %525 = vmatpush.msra.mxu0 %v1663_v7 }
  0x9a   :  { %584 = vmatpush.msra.mxu2 %v1209_v63  ;;  %605 = vmatpush.msra.mxu3 %v1216_v20  ;;  %v1674_v20 = vld [vmem:[#allocation25_spill] sm:$0xff] }
  0x9b   :  { %564 = vmatpush.msra.mxu1 %v1244_v26  ;;  %526 = vmatpush.msra.mxu0 %v1664_v9 }
  0x9c   :  { %585 = vmatpush.msra.mxu2 %v1223_v17  ;;  %606 = vmatpush.msra.mxu3 %v1230_v23  ;;  %v1671_v17 = vld [vmem:[#allocation22_spill] sm:$0xff] }
  0x9d   :  { %565 = vmatpush.msra.mxu1 %v1258_v29  ;;  %527 = vmatpush.msra.mxu0 %v1665_v10 }
  0x9e   :  { %586 = vmatpush.msra.mxu2 %v1237_v14  ;;  %607 = vmatpush.msra.mxu3 %v1244_v26  ;;  %v1672_v14 = vld [vmem:[#allocation23_spill] sm:$0xff] }
  0x9f   :  { %566 = vmatpush.msra.mxu1 %v1272_v32  ;;  %528 = vmatpush.msra.mxu0 %v1666_v12 }
  0xa0   :  { %587 = vmatpush.msra.mxu2 %v1251_v11  ;;  %608 = vmatpush.msra.mxu3 %v1258_v29  ;;  %v1673_v11 = vld [vmem:[#allocation24_spill] sm:$0xff] }
  0xa1   :  { %455 = vmatmul.f32.vlgmr.msrb.gmra.mxu1 %v722_v24  ;;  %475 = vmatmul.f32.vlgmr.msrb.gmra.mxu2 %v705_v19 }
  0xa2   :  { %529 = vmatpush.msra.mxu0 %v1667_v13  ;;  %567 = vmatpush.msra.mxu1 %v1671_v17 }
  0xa3   :  { %588 = vmatpush.msra.mxu2 %v1265_v8  ;;  %609 = vmatpush.msra.mxu3 %v1272_v32  ;;  %v756_v8 = vld [vmem:[%s1576_s0 + $0x22] sm:$0xff] }
  0xa4   :  { %530 = vmatpush.msra.mxu0 %v1668_v15  ;;  %568 = vmatpush.msra.mxu1 %v1672_v14 }
  0xa5   :  { %589 = vmatpush.msra.mxu2 %v1279_v5  ;;  %610 = vmatpush.msra.mxu3 %v1671_v17  ;;  %v773_v5 = vld [vmem:[%s1576_s0 + $0x32] sm:$0xff]  ;;  %s778_s0 = smov 64  }
  0xa6   :  { %531 = vmatpush.msra.mxu0 %v1669_v18  ;;  %569 = vmatpush.msra.mxu1 %v1673_v11 }
  0xa7   :  { %590 = vmatpush.msra.mxu2 %v1298_v38  ;;  %611 = vmatpush.msra.mxu3 %v1672_v14 }
  0xa8   :  { %532 = vmatpush.msra.mxu0 %v1670_v21  ;;  %570 = vmatpush.msra.mxu1 %v1674_v20 }
  0xa9   :  { %591 = vmatpush.msra.mxu2 %v1310_v41  ;;  %612 = vmatpush.msra.mxu3 %v1673_v11 }
  0xaa   :  { %533 = vmatmul.f32.vlgmr.msra.gmra.mxu0 %v1490_v22  ;;  %571 = vmatmul.f32.vlgmr.msra.gmra.mxu1 %v756_v8 }
  0xab   :  { %592 = vmatmul.f32.vlgmr.msra.gmra.mxu2 %v756_v8  ;;  %613 = vmatpush.msra.mxu3 %v1674_v20 }
  0xac   :  { %614 = vmatmul.f32.vlgmr.msra.gmra.mxu3 %v773_v5 }
  0xc0   :  { %v67_v23 = vpop.f32.mrf.mxu0  ;;  %v87_v25 = vpop.f32.mrf.mxu1 }
  0xc1   :  { %v125_v26 = vpop.f32.mrf.mxu2  ;;  %v146_v27 = vpop.f32.mrf.mxu3  ;;  %v88_v28 = vadd.f32 %v87_v25, %v67_v23 }
  0xc3   :  { %v128_v32 = vadd.f32 %v125_v26, %v88_v28 }
  0xca   :  { %v166_v29 = vpop.f32.mrf.mxu0  ;;  %v204_v31 = vpop.f32.mrf.mxu1 }
  0xcb   :  { %v167_v30 = vadd.f32 %v166_v29, %v146_v27  ;;  %v225_v33 = vpop.f32.mrf.mxu2  ;;  %v207_v35 = vadd.f32 %v204_v31, %v128_v32  ;;  %v264_v37 = vpop.f32.mrf.mxu3 }
  0xcd   :  { %v228_v34 = vadd.f32 %v225_v33, %v167_v30  ;;  %v267_v40 = vadd.f32 %v264_v37, %v207_v35 }
  0xe3   :  { %v285_v36 = vpop.f32.mrf.mxu0 }
  0xe4   :  { %v288_v38 = vadd.f32 %v285_v36, %v228_v34 }
  0xe5   :  { %v307_v39 = vpop.f32.mrf.mxu1 }
  0xe6   :  { %v310_v41 = vadd.f32 %v307_v39, %v288_v38 }
  0xe8   :  { %v311_v42 = vmax.f32 %v267_v40, %v310_v41 }
  0xea   :  { %313 = vrot.lane.b32.xlu0 %v311_v42, %s778_s0 }
 0x106   :  { %v398_v45 = vpop.f32.mrf.mxu3 }
 0x10a   :  { %v378_v44 = vpop.f32.mrf.mxu2 }
 0x10b   :  { %v399_v51 = vadd.f32 %v398_v45, %v378_v44 }
 0x10d   :  { %v435_v48 = vpop.f32.mrf.mxu0 }
 0x10e   :  { %v438_v55 = vadd.f32 %v435_v48, %v399_v51 }
 0x10f   :  { %v513_v52 = vpop.f32.mrf.mxu3 }
 0x110   :  { %v516_v59 = vadd.f32 %v513_v52, %v438_v55 }
 0x11e   :  { %v456_v49 = vpop.f32.mrf.mxu1 }
 0x124   :  { %v476_v50 = vpop.f32.mrf.mxu2 }
 0x125   :  { %v477_v53 = vadd.f32 %v476_v50, %v456_v49 }
 0x127   :  { %v534_v54 = vpop.f32.mrf.mxu0  ;;  %v572_v57 = vpop.f32.mrf.mxu1 }
 0x128   :  { %v537_v56 = vadd.f32 %v534_v54, %v477_v53  ;;  %v575_v62 = vadd.f32 %v572_v57, %v516_v59 }
 0x12e   :  { %v593_v58 = vpop.f32.mrf.mxu2 }
 0x12f   :  { %v596_v60 = vadd.f32 %v593_v58, %v537_v56  ;;  %v615_v61 = vpop.f32.mrf.mxu3 }
 0x131   :  { %v618_v63 = vadd.f32 %v615_v61, %v596_v60 }
 0x133   :  { %v619_v43 = vmax.f32 %v575_v62, %v618_v63 }
 0x135   :  { %621 = vrot.lane.b32.xlu0 %v619_v43, %s778_s0 }
 0x15c   :  { %v314_v2 = vpop.permute.xlu0 %313 }
 0x15d   :  { %v316_v47 = vmax.f32 %v311_v42, %v314_v2 }
 0x15f   :  { %v321_v0 = vadd.f32 %v776_v46, %v316_v47 }
 0x161   :  { %v322_v1 = vmax.f32 %v321_v0, 0.0 }
 0x163   :  { %324 = vst.msk [vmem:[%s1578_s3] sm:$0xff] %vm323_vm0, %v322_v1 }
 0x1a7   :  { %v622_v4 = vpop.permute.xlu0 %621 }
 0x1a8   :  { %v624_v6 = vmax.f32 %v619_v43, %v622_v4 }
 0x1aa   :  { %v629_v7 = vadd.f32 %v777_v3, %v624_v6 }
 0x1ac   :  { %v630_v9 = vmax.f32 %v629_v7, 0.0 }
 0x1ae   :  { %774 = vst.msk [vmem:[%s1578_s3 + $0x8] sm:$0xff] %vm323_vm0, %v630_v9 }

</bundles_post_ra>
